<compile_context>
chip_gen: v7x
topology: tpu7x:2x2x1
jax: 0.10.0
libtpu: 0.0.40
codegen_flags: <defaults>
</compile_context>

<pallas_src>
import functools

import jax
import jax.numpy as jnp
from jax.experimental import pallas as pl
from jax.experimental.pallas import tpu as pltpu

LOG_SIG_MAX = 2.0
LOG_SIG_MIN = -20.0
LANE = 128


def _round_up(x, m):
    return (x + m - 1) // m * m


# -----------------------------------------------------------------------------
# Kernel
# -----------------------------------------------------------------------------
def policy_fwd_kernel(s_ref, wpref_ref, w1s_ref, w1w_ref, b1_ref,
                      w2_ref, b2_ref, wh_ref, bh_ref, out_ref, *, num_actions):
    # Layer 1: split matmul replaces concat([state, w], 1) @ W1.
    h1 = (jnp.dot(s_ref[...], w1s_ref[...], preferred_element_type=jnp.float32)
          + jnp.dot(wpref_ref[...], w1w_ref[...], preferred_element_type=jnp.float32)
          + b1_ref[...])
    h1 = jnp.maximum(h1, 0.0)                                   # ReLU

    h2 = jnp.dot(h1, w2_ref[...], preferred_element_type=jnp.float32) + b2_ref[...]
    h2 = jnp.maximum(h2, 0.0)                                   # ReLU

    # Fused heads: one matmul produces [mean | log_std | zero-pad] along lanes.
    y = jnp.dot(h2, wh_ref[...], preferred_element_type=jnp.float32) + bh_ref[...]

    # Clamp only the log_std lanes [A, 2A). Padded lanes are exactly 0 and
    # clip(0) == 0, so applying the clamp to them too is harmless.
    lane = jax.lax.broadcasted_iota(jnp.int32, y.shape, dimension=1)
    y = jnp.where(lane >= num_actions, jnp.clip(y, LOG_SIG_MIN, LOG_SIG_MAX), y)

    out_ref[...] = y


# -----------------------------------------------------------------------------
# Parameter init / packing (packing happens once, offline)
# -----------------------------------------------------------------------------
def xavier_uniform(key, fan_in, fan_out, dtype=jnp.float32):
    # torch.nn.init.xavier_uniform_ with gain=1 (weights stored as (in, out) = W^T)
    bound = jnp.sqrt(6.0 / (fan_in + fan_out))
    return jax.random.uniform(key, (fan_in, fan_out), dtype=dtype,
                              minval=-bound, maxval=bound)


def init_params(key, num_inputs, num_actions, rwd_dim, hidden_dim):
    k1, k2, k3, k4 = jax.random.split(key, 4)
    in_dim = num_inputs + rwd_dim
    return {
        "w1": xavier_uniform(k1, in_dim, hidden_dim),
        "b1": jnp.zeros((hidden_dim,), jnp.float32),
        "w2": xavier_uniform(k2, hidden_dim, hidden_dim),
        "b2": jnp.zeros((hidden_dim,), jnp.float32),
        "wm": xavier_uniform(k3, hidden_dim, num_actions),
        "bm": jnp.zeros((num_actions,), jnp.float32),
        "ws": xavier_uniform(k4, hidden_dim, num_actions),
        "bs": jnp.zeros((num_actions,), jnp.float32),
    }


def pack_params(params, num_inputs):
    """Split W1, fuse heads, zero-pad hidden/output dims to 128 lanes."""
    hidden = params["w2"].shape[0]
    num_act = params["wm"].shape[1]
    h_pad = _round_up(hidden, LANE)
    out_pad = _round_up(2 * num_act, LANE)

    w1 = params["w1"]
    w1s = jnp.zeros((num_inputs, h_pad), jnp.float32).at[:, :hidden].set(w1[:num_inputs])
    w1w = jnp.zeros((w1.shape[0] - num_inputs, h_pad), jnp.float32).at[:, :hidden].set(w1[num_inputs:])
    b1 = jnp.zeros((1, h_pad), jnp.float32).at[0, :hidden].set(params["b1"])

    w2 = jnp.zeros((h_pad, h_pad), jnp.float32).at[:hidden, :hidden].set(params["w2"])
    b2 = jnp.zeros((1, h_pad), jnp.float32).at[0, :hidden].set(params["b2"])

    wh = (jnp.zeros((h_pad, out_pad), jnp.float32)
          .at[:hidden, :num_act].set(params["wm"])
          .at[:hidden, num_act:2 * num_act].set(params["ws"]))
    bh = (jnp.zeros((1, out_pad), jnp.float32)
          .at[0, :num_act].set(params["bm"])
          .at[0, num_act:2 * num_act].set(params["bs"]))

    return {"w1s": w1s, "w1w": w1w, "b1": b1, "w2": w2, "b2": b2,
            "wh": wh, "bh": bh, "num_actions": num_act}


# -----------------------------------------------------------------------------
# Wrapper
# -----------------------------------------------------------------------------
def _derived_vmem_limit(tb, num_inputs, rwd_dim, h_pad, out_pad):
    f32 = 4
    weights = f32 * (num_inputs * h_pad + rwd_dim * h_pad + h_pad
                     + h_pad * h_pad + h_pad + h_pad * out_pad + out_pad)
    acts_per_buf = f32 * tb * (num_inputs + rwd_dim + out_pad)
    scratch = f32 * tb * (2 * h_pad + out_pad)
    total = 2 * weights + 2 * acts_per_buf + scratch   # double-buffer headroom
    return max(2 * total, 4 * 1024 * 1024)             # generous floor, well under 32 MiB


def gaussian_policy_forward(state, w, packed):
    """Pallas-backed equivalent of GaussianPolicy.forward(state, w)."""
    B, num_inputs = state.shape
    rwd_dim = w.shape[1]
    num_act = packed["num_actions"]
    h_pad = packed["w2"].shape[0]
    out_pad = packed["wh"].shape[1]

    # Batch tile: 256-row tiles when the batch is large (fills v6e/v7x MXU,
    # lets megacore shard), otherwise the whole batch as one block.
    if B <= 256:
        tb = B
    elif B % 256 == 0:
        tb = 256
    elif B % 128 == 0:
        tb = 128
    else:
        tb = B
    grid = (B // tb,)

    def full(shape):
        return pl.BlockSpec(shape, lambda i: (0, 0))   # VMEM-resident across grid

    kernel = functools.partial(policy_fwd_kernel, num_actions=num_act)

    out = pl.pallas_call(
        kernel,
        out_shape=jax.ShapeDtypeStruct((B, out_pad), jnp.float32),
        grid_spec=pltpu.PrefetchScalarGridSpec(
            num_scalar_prefetch=0,
            grid=grid,
            in_specs=[
                pl.BlockSpec((tb, num_inputs), lambda i: (i, 0)),
                pl.BlockSpec((tb, rwd_dim), lambda i: (i, 0)),
                full(packed["w1s"].shape),
                full(packed["w1w"].shape),
                full(packed["b1"].shape),
                full(packed["w2"].shape),
                full(packed["b2"].shape),
                full(packed["wh"].shape),
                full(packed["bh"].shape),
            ],
            out_specs=pl.BlockSpec((tb, out_pad), lambda i: (i, 0)),
        ),
        compiler_params=pltpu.CompilerParams(
            dimension_semantics=("parallel",),
            vmem_limit_bytes=_derived_vmem_limit(tb, num_inputs, rwd_dim, h_pad, out_pad),
        ),
    )(state, w, packed["w1s"], packed["w1w"], packed["b1"],
      packed["w2"], packed["b2"], packed["wh"], packed["bh"])

    mean = out[:, :num_act]
    log_std = out[:, num_act:2 * num_act]   # already clamped inside the kernel
    return mean, log_std


# -----------------------------------------------------------------------------
# Pure-JAX reference (unpadded, mirrors the PyTorch module exactly)
# -----------------------------------------------------------------------------
def reference_forward(state, w, params):
    x = jnp.concatenate([state, w], axis=1)
    h1 = jax.nn.relu(x @ params["w1"] + params["b1"])
    h2 = jax.nn.relu(h1 @ params["w2"] + params["b2"])
    mean = h2 @ params["wm"] + params["bm"]
    log_std = jnp.clip(h2 @ params["ws"] + params["bs"], LOG_SIG_MIN, LOG_SIG_MAX)
    return mean, log_std


if __name__ == "__main__":
    num_inputs, num_actions, rwd_dim, hidden_dim = 8, 4, 3, 32

    key = jax.random.PRNGKey(0)
    kp, ks, kw, ks2, kw2 = jax.random.split(key, 5)

    params = init_params(kp, num_inputs, num_actions, rwd_dim, hidden_dim)
    packed = pack_params(params, num_inputs)

    # Small-batch path (gridless single block).
    B = 2
    state = jax.random.normal(ks, (B, num_inputs), jnp.float32)
    w = jax.random.normal(kw, (B, rwd_dim), jnp.float32)

    mean, log_std = gaussian_policy_forward(state, w, packed)
    jax.block_until_ready((mean, log_std))

    mean_ref, log_std_ref = reference_forward(state, w, params)
    assert mean.shape == (B, num_actions) and log_std.shape == (B, num_actions)
    assert jnp.allclose(mean, mean_ref, atol=1e-5), "mean mismatch (small batch)"
    assert jnp.allclose(log_std, log_std_ref, atol=1e-5), "log_std mismatch (small batch)"

    # Large-batch path (exercises the batch grid: TB=256, grid=(2,)).
    B2 = 512
    state2 = jax.random.normal(ks2, (B2, num_inputs), jnp.float32)
    w2 = jax.random.normal(kw2, (B2, rwd_dim), jnp.float32)

    mean2, log_std2 = gaussian_policy_forward(state2, w2, packed)
    jax.block_until_ready((mean2, log_std2))

    mean2_ref, log_std2_ref = reference_forward(state2, w2, params)
    assert jnp.allclose(mean2, mean2_ref, atol=1e-5), "mean mismatch (large batch)"
    assert jnp.allclose(log_std2, log_std2_ref, atol=1e-5), "log_std mismatch (large batch)"

    # TODO(synk): GaussianPolicy.sample (rsample + tanh squash + log_prob) is a
    # stochastic path not requested here; only forward() is implemented.

    print("KERNEL_OK")
</pallas_src>

<mosaic_0001>
module attributes {stable_mosaic.version = 11 : i64} {
  func.func @policy_fwd_kernel(%arg0: i32, %arg1: memref<2x8xf32, #tpu.memory_space<vmem>>, %arg2: memref<2x3xf32, #tpu.memory_space<vmem>>, %arg3: memref<8x128xf32, #tpu.memory_space<vmem>>, %arg4: memref<3x128xf32, #tpu.memory_space<vmem>>, %arg5: memref<1x128xf32, #tpu.memory_space<vmem>>, %arg6: memref<128x128xf32, #tpu.memory_space<vmem>>, %arg7: memref<1x128xf32, #tpu.memory_space<vmem>>, %arg8: memref<128x128xf32, #tpu.memory_space<vmem>>, %arg9: memref<1x128xf32, #tpu.memory_space<vmem>>, %arg10: memref<2x128xf32, #tpu.memory_space<vmem>>) attributes {dimension_semantics = [#tpu.dimension_semantics<parallel>], iteration_bounds = array<i64: 1>, scalar_prefetch = 0 : i64, scratch_operands = 0 : i64, tpu.core_type = #tpu.core_type<tc>, window_params = [{transform_indices = @transform_0, window_bounds = array<i64: 2, 8>}, {transform_indices = @transform_1, window_bounds = array<i64: 2, 3>}, {pipeline_mode = #tpu.pipeline_mode<synchronous>, transform_indices = @transform_2, window_bounds = array<i64: 8, 128>}, {pipeline_mode = #tpu.pipeline_mode<synchronous>, transform_indices = @transform_3, window_bounds = array<i64: 3, 128>}, {pipeline_mode = #tpu.pipeline_mode<synchronous>, transform_indices = @transform_4, window_bounds = array<i64: 1, 128>}, {pipeline_mode = #tpu.pipeline_mode<synchronous>, transform_indices = @transform_5, window_bounds = array<i64: 128, 128>}, {pipeline_mode = #tpu.pipeline_mode<synchronous>, transform_indices = @transform_6, window_bounds = array<i64: 1, 128>}, {pipeline_mode = #tpu.pipeline_mode<synchronous>, transform_indices = @transform_7, window_bounds = array<i64: 128, 128>}, {pipeline_mode = #tpu.pipeline_mode<synchronous>, transform_indices = @transform_8, window_bounds = array<i64: 1, 128>}, {transform_indices = @transform_9, window_bounds = array<i64: 2, 128>}]} {
    %c0 = arith.constant 0 : index
    %c0_0 = arith.constant 0 : index
    %0 = vector.load %arg1[%c0, %c0_0] : memref<2x8xf32, #tpu.memory_space<vmem>>, vector<2x8xf32>
    %c0_1 = arith.constant 0 : index
    %c0_2 = arith.constant 0 : index
    %1 = vector.load %arg3[%c0_1, %c0_2] : memref<8x128xf32, #tpu.memory_space<vmem>>, vector<8x128xf32>
    %cst = arith.constant dense<0.000000e+00> : vector<2x128xf32>
    %2 = tpu.matmul %0, %1, %cst {dimension_numbers = #tpu.dot_dimension_numbers<[1], [0], [0], [1], [0, 0, 1, 1], [], []>} : vector<2x8xf32>, vector<8x128xf32>, vector<2x128xf32> -> vector<2x128xf32>
    %c0_3 = arith.constant 0 : index
    %c0_4 = arith.constant 0 : index
    %3 = vector.load %arg2[%c0_3, %c0_4] : memref<2x3xf32, #tpu.memory_space<vmem>>, vector<2x3xf32>
    %c0_5 = arith.constant 0 : index
    %c0_6 = arith.constant 0 : index
    %4 = vector.load %arg4[%c0_5, %c0_6] : memref<3x128xf32, #tpu.memory_space<vmem>>, vector<3x128xf32>
    %cst_7 = arith.constant dense<0.000000e+00> : vector<2x128xf32>
    %5 = tpu.matmul %3, %4, %cst_7 {dimension_numbers = #tpu.dot_dimension_numbers<[1], [0], [0], [1], [0, 0, 1, 1], [], []>} : vector<2x3xf32>, vector<3x128xf32>, vector<2x128xf32> -> vector<2x128xf32>
    %6 = arith.addf %2, %5 : vector<2x128xf32>
    %c0_8 = arith.constant 0 : index
    %c0_9 = arith.constant 0 : index
    %7 = vector.load %arg5[%c0_8, %c0_9] : memref<1x128xf32, #tpu.memory_space<vmem>>, vector<1x128xf32>
    %8 = vector.broadcast %7 : vector<1x128xf32> to vector<2x128xf32>
    %9 = arith.addf %6, %8 : vector<2x128xf32>
    %cst_10 = arith.constant 0.000000e+00 : f32
    %10 = vector.broadcast %cst_10 : f32 to vector<2x128xf32>
    %11 = arith.maximumf %9, %10 : vector<2x128xf32>
    %c0_11 = arith.constant 0 : index
    %c0_12 = arith.constant 0 : index
    %12 = vector.load %arg6[%c0_11, %c0_12] : memref<128x128xf32, #tpu.memory_space<vmem>>, vector<128x128xf32>
    %cst_13 = arith.constant dense<0.000000e+00> : vector<2x128xf32>
    %13 = tpu.matmul %11, %12, %cst_13 {dimension_numbers = #tpu.dot_dimension_numbers<[1], [0], [0], [1], [0, 0, 1, 1], [], []>} : vector<2x128xf32>, vector<128x128xf32>, vector<2x128xf32> -> vector<2x128xf32>
    %c0_14 = arith.constant 0 : index
    %c0_15 = arith.constant 0 : index
    %14 = vector.load %arg7[%c0_14, %c0_15] : memref<1x128xf32, #tpu.memory_space<vmem>>, vector<1x128xf32>
    %15 = vector.broadcast %14 : vector<1x128xf32> to vector<2x128xf32>
    %16 = arith.addf %13, %15 : vector<2x128xf32>
    %cst_16 = arith.constant 0.000000e+00 : f32
    %17 = vector.broadcast %cst_16 : f32 to vector<2x128xf32>
    %18 = arith.maximumf %16, %17 : vector<2x128xf32>
    %c0_17 = arith.constant 0 : index
    %c0_18 = arith.constant 0 : index
    %19 = vector.load %arg8[%c0_17, %c0_18] : memref<128x128xf32, #tpu.memory_space<vmem>>, vector<128x128xf32>
    %cst_19 = arith.constant dense<0.000000e+00> : vector<2x128xf32>
    %20 = tpu.matmul %18, %19, %cst_19 {dimension_numbers = #tpu.dot_dimension_numbers<[1], [0], [0], [1], [0, 0, 1, 1], [], []>} : vector<2x128xf32>, vector<128x128xf32>, vector<2x128xf32> -> vector<2x128xf32>
    %c0_20 = arith.constant 0 : index
    %c0_21 = arith.constant 0 : index
    %21 = vector.load %arg9[%c0_20, %c0_21] : memref<1x128xf32, #tpu.memory_space<vmem>>, vector<1x128xf32>
    %22 = vector.broadcast %21 : vector<1x128xf32> to vector<2x128xf32>
    %23 = arith.addf %20, %22 : vector<2x128xf32>
    %24 = tpu.iota {dimensions = array<i32: 1>} : vector<2x128xi32>
    %c4_i32 = arith.constant 4 : i32
    %25 = vector.broadcast %c4_i32 : i32 to vector<2x128xi32>
    %26 = arith.cmpi sge, %24, %25 : vector<2x128xi32>
    %cst_22 = arith.constant -2.000000e+01 : f32
    %cst_23 = arith.constant 2.000000e+00 : f32
    %27 = vector.broadcast %cst_22 : f32 to vector<2x128xf32>
    %28 = arith.maximumf %27, %23 : vector<2x128xf32>
    %29 = vector.broadcast %cst_23 : f32 to vector<2x128xf32>
    %30 = arith.minimumf %29, %28 : vector<2x128xf32>
    %31 = arith.select %26, %30, %23 : vector<2x128xi1>, vector<2x128xf32>
    %c0_24 = arith.constant 0 : index
    %c0_25 = arith.constant 0 : index
    %32 = vector.load %arg10[%c0_24, %c0_25] : memref<2x128xf32, #tpu.memory_space<vmem>>, vector<2x128xf32>
    tpu.vector_store %arg10[%c0_24, %c0_25], %31 {strides = array<i32>} : memref<2x128xf32, #tpu.memory_space<vmem>>, vector<2x128xf32>,
    return
  }
  func.func @transform_0(%arg0: i32) -> (i32, i32) {
    %c0_i32 = arith.constant 0 : i32
    %c0_i32_0 = arith.constant 0 : i32
    return %arg0, %c0_i32 : i32, i32
  }
  func.func @transform_1(%arg0: i32) -> (i32, i32) {
    %c0_i32 = arith.constant 0 : i32
    %c0_i32_0 = arith.constant 0 : i32
    return %arg0, %c0_i32 : i32, i32
  }
  func.func @transform_2(%arg0: i32) -> (i32, i32) {
    %c0_i32 = arith.constant 0 : i32
    %c0_i32_0 = arith.constant 0 : i32
    %c0_i32_1 = arith.constant 0 : i32
    return %c0_i32, %c0_i32_0 : i32, i32
  }
  func.func @transform_3(%arg0: i32) -> (i32, i32) {
    %c0_i32 = arith.constant 0 : i32
    %c0_i32_0 = arith.constant 0 : i32
    %c0_i32_1 = arith.constant 0 : i32
    return %c0_i32, %c0_i32_0 : i32, i32
  }
  func.func @transform_4(%arg0: i32) -> (i32, i32) {
    %c0_i32 = arith.constant 0 : i32
    %c0_i32_0 = arith.constant 0 : i32
    %c0_i32_1 = arith.constant 0 : i32
    return %c0_i32, %c0_i32_0 : i32, i32
  }
  func.func @transform_5(%arg0: i32) -> (i32, i32) {
    %c0_i32 = arith.constant 0 : i32
    %c0_i32_0 = arith.constant 0 : i32
    %c0_i32_1 = arith.constant 0 : i32
    return %c0_i32, %c0_i32_0 : i32, i32
  }
  func.func @transform_6(%arg0: i32) -> (i32, i32) {
    %c0_i32 = arith.constant 0 : i32
    %c0_i32_0 = arith.constant 0 : i32
    %c0_i32_1 = arith.constant 0 : i32
    return %c0_i32, %c0_i32_0 : i32, i32
  }
  func.func @transform_7(%arg0: i32) -> (i32, i32) {
    %c0_i32 = arith.constant 0 : i32
    %c0_i32_0 = arith.constant 0 : i32
    %c0_i32_1 = arith.constant 0 : i32
    return %c0_i32, %c0_i32_0 : i32, i32
  }
  func.func @transform_8(%arg0: i32) -> (i32, i32) {
    %c0_i32 = arith.constant 0 : i32
    %c0_i32_0 = arith.constant 0 : i32
    %c0_i32_1 = arith.constant 0 : i32
    return %c0_i32, %c0_i32_0 : i32, i32
  }
  func.func @transform_9(%arg0: i32) -> (i32, i32) {
    %c0_i32 = arith.constant 0 : i32
    %c0_i32_0 = arith.constant 0 : i32
    return %arg0, %c0_i32 : i32, i32
  }
}

</mosaic_0001>

<bundles_post_ra>
// kernel: tpu_custom_call.1
= control target key start
LH: loop header
LB: loop body
LE: loop exit
PB: predicated region body
PF: predicated region fallthrough
CT: control target
= control target key end

     0   :  { %14 = vsyncpa [#allocation3], 0  ;;  %s915_s0 = inlined_call_operand.hbm [shape: f32[2,8], index: 0, kind: input, shape index: {}]   ;;  %s916_s1 = inlined_call_operand.vmem [shape: f32[2,3], index: 1, kind: input, shape index: {}]   ;;  %s917_s2 = inlined_call_operand.hbm [shape: f32[8,128], index: 2, kind: input, shape index: {}]   ;;  %s918_s3 = inlined_call_operand.vmem [shape: f32[3,128], index: 3, kind: input, shape index: {}]   ;;  %s919_s4 = inlined_call_operand.vmem [shape: f32[1,128], index: 4, kind: input, shape index: {}]   ;;  %s920_s5 = inlined_call_operand.hbm [shape: f32[128,128], index: 5, kind: input, shape index: {}]   ;;  %s921_s6 = inlined_call_operand.vmem [shape: f32[1,128], index: 6, kind: input, shape index: {}]   ;;  %s922_s7 = inlined_call_operand.hbm [shape: f32[128,128], index: 7, kind: input, shape index: {}]   ;;  %s923_s8 = inlined_call_operand.vmem [shape: f32[1,128], index: 8, kind: input, shape index: {}]   ;;  %s924_s9 = inlined_call_operand.hbm [shape: f32[2,128], index: 9, kind: output, shape index: {}]  }
   0x1   :  { %15 = vsyncpa [#allocation6], 0 }
   0x2   :  { %16 = vsyncpa [#allocation9], 0 }
   0x3   :  { %17 = vsyncpa [#allocation4], 0  ;;  %s760_s30 = smov [#allocation5]   ;;  %s761_s11 = smov [#allocation2]  }
   0x4   :  { %s36_s10 = sshll.u32 %s760_s30, 4  ;;  %s24_s12 = sshll.u32 %s761_s11, 4  ;;  %s37_s10 = int_to_ptr.vmem [resolvable:$true] %s36_s10  ;;  %s25_s12 = int_to_ptr.vmem [resolvable:$true] %s24_s12 }
   0x5   :  { %s642_s15 = scalar_lea.hbm %s917_s2, 128 }
   0x6   :  { %p643_p0 = scmp.ne.s32.totalorder %s917_s2, %s642_s15  ;;  %p646_p1 = scmp.lt.u32.totalorder %s642_s15, %s917_s2 }
   0x8   :  { %p648_p2 = pnand %p646_p1, %p643_p0 }
   0xa   :  { %651 = shalt.err (!%p648_p2)
}
   0xb   :  { %s652_s20 = scalar_lea.vmem %s37_s10, 128  ;;  %p657_p4 = scmp.lt.s32.totalorder %s37_s10, %s37_s10 }
   0xc   :  { %p653_p3 = scmp.ne.s32.totalorder %s37_s10, %s652_s20  ;;  %p658_p5 = scmp.lt.s32.totalorder %s652_s20, %s652_s20 }
   0xe   :  { %p659_p6 = por %p658_p5, %p657_p4 }
  0x10   :  { %p660_p7 = pnand %p659_p6, %p653_p3 }
  0x12   :  { %663 = shalt.err (!%p660_p7)
}
  0x13   :  { %39 = dma.hbm_to_vmem [thread:$0]  %s917_s2, 128, %s37_s10, [#allocation6]  }
  0x14   :  { %s664_s25 = scalar_lea.hbm %s915_s0, 32 }
  0x15   :  { %p665_p8 = scmp.ne.s32.totalorder %s915_s0, %s664_s25  ;;  %p668_p9 = scmp.lt.u32.totalorder %s664_s25, %s915_s0 }
  0x17   :  { %p670_p10 = pnand %p668_p9, %p665_p8 }
  0x19   :  { %673 = shalt.err (!%p670_p10)
}
  0x1a   :  { %s674_s30 = scalar_lea.vmem %s25_s12, 32  ;;  %p679_p12 = scmp.lt.s32.totalorder %s25_s12, %s25_s12 }
  0x1b   :  { %p675_p11 = scmp.ne.s32.totalorder %s25_s12, %s674_s30  ;;  %p680_p13 = scmp.lt.s32.totalorder %s674_s30, %s674_s30 }
  0x1d   :  { %p681_p0 = por %p680_p13, %p679_p12 }
  0x1f   :  { %p682_p1 = pnand %p681_p0, %p675_p11 }
  0x21   :  { %685 = shalt.err (!%p682_p1)
}
  0x22   :  { %27 = dma.hbm_to_vmem [thread:$0]  %s915_s0, 32, %s25_s12, [#allocation3]  }
  0x23   :  { %s762_s11 = smov [#allocation7]   ;;  %s686_s16 = scalar_lea.hbm %s920_s5, 2048 }
  0x24   :  { %s49_s13 = sshll.u32 %s762_s11, 4  ;;  %p687_p2 = scmp.ne.s32.totalorder %s920_s5, %s686_s16  ;;  %s50_s13 = int_to_ptr.vmem [resolvable:$true] %s49_s13 }
  0x25   :  { %p690_p3 = scmp.lt.u32.totalorder %s686_s16, %s920_s5 }
  0x27   :  { %p692_p4 = pnand %p690_p3, %p687_p2 }
  0x29   :  { %695 = shalt.err (!%p692_p4)
}
  0x2a   :  { %s696_s21 = scalar_lea.vmem %s50_s13, 2048  ;;  %p701_p6 = scmp.lt.s32.totalorder %s50_s13, %s50_s13 }
  0x2b   :  { %p697_p5 = scmp.ne.s32.totalorder %s50_s13, %s696_s21  ;;  %p702_p7 = scmp.lt.s32.totalorder %s696_s21, %s696_s21 }
  0x2d   :  { %p703_p8 = por %p702_p7, %p701_p6 }
  0x2f   :  { %p704_p9 = pnand %p703_p8, %p697_p5 }
  0x31   :  { %707 = shalt.err (!%p704_p9)
}
  0x32   :  { %s763_s0 = smov 128   ;;  %s764_s12 = smov 8  }
  0x33   :  { %55 = dma.hbm_to_vmem [thread:$0]  %s920_s5, 2048, %s50_s13, [#allocation6], %s763_s0, %s763_s0, %s764_s12  }
  0x34   :  { %s765_s24 = smov [#allocation8]   ;;  %s708_s28 = scalar_lea.hbm %s922_s7, 2048 }
  0x35   :  { %s63_s25 = sshll.u32 %s765_s24, 4  ;;  %p709_p10 = scmp.ne.s32.totalorder %s922_s7, %s708_s28  ;;  %s64_s25 = int_to_ptr.vmem [resolvable:$true] %s63_s25 }
  0x36   :  { %p712_p11 = scmp.lt.u32.totalorder %s708_s28, %s922_s7 }
  0x38   :  { %p714_p12 = pnand %p712_p11, %p709_p10 }
  0x3a   :  { %717 = shalt.err (!%p714_p12)
}
  0x3b   :  { %s718_s11 = scalar_lea.vmem %s64_s25, 2048  ;;  %p723_p0 = scmp.lt.s32.totalorder %s64_s25, %s64_s25 }
  0x3c   :  { %p719_p13 = scmp.ne.s32.totalorder %s64_s25, %s718_s11  ;;  %p724_p1 = scmp.lt.s32.totalorder %s718_s11, %s718_s11 }
  0x3e   :  { %p725_p2 = por %p724_p1, %p723_p0 }
  0x40   :  { %p726_p3 = pnand %p725_p2, %p719_p13 }
  0x42   :  { %729 = shalt.err (!%p726_p3)
}
  0x43   :  { %69 = dma.hbm_to_vmem [thread:$0]  %s922_s7, 2048, %s64_s25, [#allocation9], %s763_s0, %s763_s0, %s764_s12  }
  0x44   :  { %752 = dma.done.wait [#allocation3], 32  }
  0x45   :  { %753 = vsyncadd [#allocation3], 4294967264 }
  0x46   :  { %754 = dma.done.wait [#allocation6], 2176  }
  0x47   :  { %755 = vsyncadd [#allocation6], 4294965120 }
  0x48   :  { %756 = dma.done.wait [#allocation9], 2048  }
  0x49   :  { %757 = vsyncadd [#allocation9], 4294965248  ;;  %v766_v0 = vmov 0.0   ;;  %vm767_vm0 = vmmov 0   ;;  %vm92_vm1 = vcmask 1042432   ;;  %vm88_vm2 = vcmask 23552  }
  0x4a   :  { %504 = vmatprep.subr.mxu0 %v766_v0  ;;  %509 = vmatprep.subr.mxu1 %v766_v0  ;;  %vm166_vm3 = vcmask 64512   ;;  %v87_v1 = vld [vmem:[%s918_s3] sm:$0x7]  ;;  %v85_v2 = vld [vmem:[#allocation5] sm:$0xff]  ;;  %v84_v4 = vld [vmem:[#allocation2] sm:$0x3] }
  0x4b   :  { %506 = vmatprep.mubr.msk.f32.mxu0 %vm767_vm0, %v766_v0  ;;  %511 = vmatprep.mubr.msk.f32.mxu1 %vm767_vm0, %v766_v0  ;;  %v86_v3 = vld [vmem:[%s916_s1] sm:$0x3]  ;;  %v249_v5 = vld [vmem:[#allocation7] sm:$0xff]  ;;  %v251_v8 = vld [vmem:[#allocation7 + $0x10] sm:$0xff]  ;;  %v768_v10 = vmov 0.0|0.0   ;;  %s769_s20 = smov [#allocation10]  }
  0x4c   :  { %505 = vmatpush3.msk.msra.mxu0 %vm92_vm1, %v87_v1  ;;  %510 = vmatpush3.msra.mxu1 %v85_v2  ;;  %v250_v6 = vld [vmem:[#allocation7 + $0x8] sm:$0xff]  ;;  %v252_v9 = vld [vmem:[#allocation7 + $0x18] sm:$0xff]  ;;  %v253_v12 = vld [vmem:[#allocation7 + $0x20] sm:$0xff]  ;;  %s449_s21 = sshll.u32 %s769_s20, 4  ;;  %s450_s21 = int_to_ptr.vmem [resolvable:$true] %s449_s21 }
  0x4d   :  { %507 = vmatmul.mubr.msk.f32.vlgmr.msra.gmra.mrb[0].mxu0 %vm88_vm2, %v86_v3  ;;  %512 = vmatmul.mubr.msk.f32.vlgmr.msra.gmra.mrb[0].mxu1 %vm166_vm3, %v84_v4  ;;  %v585_v7 = vpack.c.bf16 %v250_v6, %v249_v5  ;;  %v588_v11 = vpack.c.bf16 %v252_v9, %v251_v8  ;;  %v254_v13 = vld [vmem:[#allocation7 + $0x28] sm:$0xff]  ;;  %v255_v15 = vld [vmem:[#allocation7 + $0x30] sm:$0xff]  ;;  %v256_v16 = vld [vmem:[#allocation7 + $0x38] sm:$0xff]  ;;  %v436_v3 = vlaneseq  ;;  %p735_p5 = scmp.lt.s32.totalorder %s450_s21, %s450_s21 }
  0x4e   :  { %584 = vmatprep.subr.bf16.mxu0 %v768_v10  ;;  %546 = vmatprep.mubr.msk.f32.mxu0 %vm767_vm0, %v766_v0  ;;  %v591_v14 = vpack.c.bf16 %v254_v13, %v253_v12  ;;  %v594_v17 = vpack.c.bf16 %v256_v16, %v255_v15  ;;  %v257_v18 = vld [vmem:[#allocation7 + $0x40] sm:$0xff]  ;;  %v258_v19 = vld [vmem:[#allocation7 + $0x48] sm:$0xff]  ;;  %v259_v21 = vld [vmem:[#allocation7 + $0x50] sm:$0xff] }
  0x4f   :  { %586 = vmatpush3.bf16.msra.mxu0 %v585_v7  ;;  %608 = vmatprep.subr.bf16.mxu1 %v768_v10  ;;  %v597_v20 = vpack.c.bf16 %v258_v19, %v257_v18  ;;  %v260_v22 = vld [vmem:[#allocation7 + $0x58] sm:$0xff]  ;;  %v261_v24 = vld [vmem:[#allocation7 + $0x60] sm:$0xff]  ;;  %v262_v25 = vld [vmem:[#allocation7 + $0x68] sm:$0xff]  ;;  %v437_v6 = vand.u32 127, %v436_v3 }
  0x50   :  { %587 = vmatprep.subr.bf16.mxu0 %v768_v10  ;;  %581 = vmatprep.mubr.msk.f32.mxu1 %vm767_vm0, %v766_v0  ;;  %v600_v23 = vpack.c.bf16 %v260_v22, %v259_v21  ;;  %v603_v26 = vpack.c.bf16 %v262_v25, %v261_v24  ;;  %v263_v27 = vld [vmem:[#allocation7 + $0x70] sm:$0xff]  ;;  %v264_v28 = vld [vmem:[#allocation7 + $0x78] sm:$0xff]  ;;  %v343_v30 = vld [vmem:[#allocation8] sm:$0xff] }
  0x51   :  { %v606_v29 = vpack.c.bf16 %v264_v28, %v263_v27  ;;  %v344_v31 = vld [vmem:[#allocation8 + $0x8] sm:$0xff]  ;;  %v345_v32 = vld [vmem:[#allocation8 + $0x10] sm:$0xff]  ;;  %v346_v34 = vld [vmem:[#allocation8 + $0x18] sm:$0xff]  ;;  %vm438_vm4 = vcmp.ge.s32.totalorder %v437_v6, 4 }
  0x52   :  { %v609_v33 = vpack.c.bf16 %v344_v31, %v343_v30  ;;  %v612_v35 = vpack.c.bf16 %v346_v34, %v345_v32  ;;  %v347_v36 = vld [vmem:[#allocation8 + $0x20] sm:$0xff]  ;;  %v348_v37 = vld [vmem:[#allocation8 + $0x28] sm:$0xff]  ;;  %v349_v39 = vld [vmem:[#allocation8 + $0x30] sm:$0xff] }
  0x53   :  { %589 = vmatpush3.bf16.msra.mxu0 %v588_v11  ;;  %v615_v38 = vpack.c.bf16 %v348_v37, %v347_v36  ;;  %v350_v40 = vld [vmem:[#allocation8 + $0x38] sm:$0xff]  ;;  %v351_v42 = vld [vmem:[#allocation8 + $0x40] sm:$0xff]  ;;  %v352_v43 = vld [vmem:[#allocation8 + $0x48] sm:$0xff] }
  0x54   :  { %590 = vmatprep.subr.bf16.mxu0 %v768_v10  ;;  %610 = vmatpush3.bf16.msra.mxu1 %v609_v33  ;;  %v618_v41 = vpack.c.bf16 %v350_v40, %v349_v39  ;;  %v621_v44 = vpack.c.bf16 %v352_v43, %v351_v42  ;;  %v353_v45 = vld [vmem:[#allocation8 + $0x50] sm:$0xff]  ;;  %v354_v46 = vld [vmem:[#allocation8 + $0x58] sm:$0xff]  ;;  %v355_v48 = vld [vmem:[#allocation8 + $0x60] sm:$0xff] }
  0x55   :  { %611 = vmatprep.subr.bf16.mxu1 %v768_v10  ;;  %v624_v47 = vpack.c.bf16 %v354_v46, %v353_v45  ;;  %v356_v49 = vld [vmem:[#allocation8 + $0x68] sm:$0xff]  ;;  %v357_v59 = vld [vmem:[#allocation8 + $0x70] sm:$0xff]  ;;  %v358_v60 = vld [vmem:[#allocation8 + $0x78] sm:$0xff] }
  0x56   :  { %v627_v50 = vpack.c.bf16 %v356_v49, %v355_v48  ;;  %v463_v53 = vld [vmem:[%s919_s4] ss:$0 sm:$0xff]  ;;  %v630_v61 = vpack.c.bf16 %v358_v60, %v357_v59 }
  0x57   :  { %592 = vmatpush3.bf16.msra.mxu0 %v591_v14  ;;  %v464_v62 = vld [vmem:[%s921_s6] ss:$0 sm:$0xff]  ;;  %s730_s6 = scalar_lea.vmem %s450_s21, 32 }
  0x58   :  { %593 = vmatprep.subr.bf16.mxu0 %v768_v10  ;;  %613 = vmatpush3.bf16.msra.mxu1 %v612_v35  ;;  %v465_v4 = vld [vmem:[%s923_s8] ss:$0 sm:$0xff]  ;;  %p731_p4 = scmp.ne.s32.totalorder %s450_s21, %s730_s6  ;;  %p736_p6 = scmp.lt.s32.totalorder %s730_s6, %s730_s6 }
  0x59   :  { %614 = vmatprep.subr.bf16.mxu1 %v768_v10 }
  0x5a   :  { %p737_p7 = por %p736_p6, %p735_p5 }
  0x5b   :  { %595 = vmatpush3.bf16.msra.mxu0 %v594_v17 }
  0x5c   :  { %596 = vmatprep.subr.bf16.mxu0 %v768_v10  ;;  %616 = vmatpush3.bf16.msra.mxu1 %v615_v38  ;;  %p738_p8 = pnand %p737_p7, %p731_p4 }
  0x5d   :  { %617 = vmatprep.subr.bf16.mxu1 %v768_v10 }
  0x5f   :  { %598 = vmatpush3.bf16.msra.mxu0 %v597_v20 }
  0x60   :  { %599 = vmatprep.subr.bf16.mxu0 %v768_v10  ;;  %619 = vmatpush3.bf16.msra.mxu1 %v618_v41 }
  0x61   :  { %620 = vmatprep.subr.bf16.mxu1 %v768_v10 }
  0x63   :  { %601 = vmatpush3.bf16.msra.mxu0 %v600_v23 }
  0x64   :  { %602 = vmatprep.subr.bf16.mxu0 %v768_v10  ;;  %622 = vmatpush3.bf16.msra.mxu1 %v621_v44 }
  0x65   :  { %623 = vmatprep.subr.bf16.mxu1 %v768_v10 }
  0x67   :  { %604 = vmatpush3.bf16.msra.mxu0 %v603_v26 }
  0x68   :  { %605 = vmatprep.subr.bf16.mxu0 %v768_v10  ;;  %625 = vmatpush3.bf16.msra.mxu1 %v624_v47 }
  0x69   :  { %626 = vmatprep.subr.bf16.mxu1 %v768_v10 }
  0x6b   :  { %607 = vmatpush3.bf16.msra.mxu0 %v606_v29 }
  0x6c   :  { %628 = vmatpush3.bf16.msra.mxu1 %v627_v50 }
  0x6d   :  { %629 = vmatprep.subr.bf16.mxu1 %v768_v10 }
  0x70   :  { %631 = vmatpush3.bf16.msra.mxu1 %v630_v61 }
 0x120   :  { %v162_v51 = vpop.f32.mrb[0].mxu0  ;;  %v236_v52 = vpop.f32.mrb[0].mxu1 }
 0x121   :  { %v237_v54 = vadd.f32 %v236_v52, %v162_v51  ;;  %v508_v55 = vpop.f32.mrb[1].mxu0  ;;  %v513_v56 = vpop.f32.mrb[1].mxu1 }
 0x123   :  { %v247_v57 = vadd.f32 %v463_v53, %v237_v54 }
 0x125   :  { %v248_v58 = vmax.f32 %v247_v57, 0.0 }
 0x127   :  { %547 = vmatmul.mubr.f32.vlgmr.msra.gmra.mrb[2].mxu0 %v248_v58 }
 0x1fa   :  { %v338_v63 = vpop.f32.mrb[2].mxu0 }
 0x1fb   :  { %v339_v0 = vadd.f32 %v464_v62, %v338_v63  ;;  %v548_v1 = vpop.f32.mrb[3].mxu0 }
 0x1fd   :  { %v342_v2 = vmax.f32 %v339_v0, 0.0 }
 0x1ff   :  { %582 = vmatmul.mubr.f32.vlgmr.msra.gmra.mrb[2].mxu1 %v342_v2 }
 0x2d2   :  { %v432_v5 = vpop.f32.mrb[2].mxu1 }
 0x2d3   :  { %v433_v7 = vadd.f32 %v465_v4, %v432_v5  ;;  %v583_v8 = vpop.f32.mrb[3].mxu1 }
 0x2d5   :  { %v439_v9 = vmax.f32 %v433_v7, -20.0 }
 0x2d7   :  { %v440_v10 = vmin.f32 %v439_v9, 2.0 }
 0x2d9   :  { %v441_v11 = vsel %vm438_vm4, %v440_v10, %v433_v7 }
 0x2da   :  { %442 = vst [vmem:[#allocation10] sm:$0x3] %v441_v11 }
 0x2db   :  { %741 = shalt.err (!%p738_p8)
}
 0x2dc   :  { %s742_s12 = scalar_lea.hbm %s924_s9, 32 }
 0x2dd   :  { %p743_p9 = scmp.ne.s32.totalorder %s924_s9, %s742_s12  ;;  %p746_p10 = scmp.lt.u32.totalorder %s742_s12, %s924_s9 }
 0x2df   :  { %p748_p11 = pnand %p746_p10, %p743_p9 }
 0x2e1   :  { %751 = shalt.err (!%p748_p11)
}
 0x2e2   :  { %452 = dma.vmem_to_hbm [thread:$0]  %s450_s21, 32, %s924_s9, [#allocation4]  }
 0x2e3   :  { %758 = dma.done.wait [#allocation4], 32  }
 0x2e4   :  { %759 = vsyncadd [#allocation4], 4294967264 }
 0x2e5   :  { %456 = vsyncpa [#allocation3], 1 }
 0x2e6   :  { %457 = vsyncpa [#allocation6], 1 }
 0x2e7   :  { %458 = vsyncpa [#allocation9], 1 }
 0x2e8   :  { %459 = vsyncpa [#allocation4], 1 }

</bundles_post_ra>
